<compile_context>
chip_gen: v5e
topology: v5e:2x2
jax: 0.10.0
libtpu: 0.0.40
codegen_flags: <defaults>
</compile_context>

<pallas_src>
import functools

import jax
import jax.numpy as jnp
import numpy as np
from jax.experimental import pallas as pl
from jax.experimental.pallas import tpu as pltpu

_LANE = 128
_SUBLANE = 8


def _round_up(n, m):
    return (n + m - 1) // m * m


# ----------------------------------------------------------------------------
# Fused kernels: pool (over spatial tiles) -> project -> head epilogue.
#   x:        [TB, C, TS]   bf16 tile of the (padded) image
#   wb:       [C,  Dp]      bf16 backbone projection (D padded to 128)
#   bb:       [1,  Dp]      f32  backbone bias
#   linear head:  wc [Dp, Kp] bf16, bc [1, Kp] f32   (1/temperature folded in)
#   proto head:   pt [Dp, Kp] bf16  (L2-normalized, transposed, 1/temperature folded)
#   out:      [TB, Kp]      f32 logits (Kp = num_classes padded to 128)
#   pooled_acc: VMEM [TB, C] f32 spatial-sum accumulator
# ----------------------------------------------------------------------------
def _fused_linear_kernel(x_ref, wb_ref, bb_ref, wc_ref, bc_ref, out_ref,
                         pooled_acc, *, inv_s):
    s_idx = pl.program_id(1)

    @pl.when(s_idx == 0)
    def _init():
        pooled_acc[...] = jnp.zeros_like(pooled_acc)

    # Spatial-sum pooling, accumulated in f32.
    pooled_acc[...] += jnp.sum(x_ref[...].astype(jnp.float32), axis=-1)

    @pl.when(s_idx == pl.num_programs(1) - 1)
    def _finalize():
        pooled = (pooled_acc[...] * inv_s).astype(jnp.bfloat16)            # [TB, C]
        feat = jnp.dot(pooled, wb_ref[...],
                       preferred_element_type=jnp.float32) + bb_ref[...]    # [TB, Dp]
        logits = jnp.dot(feat.astype(jnp.bfloat16), wc_ref[...],
                         preferred_element_type=jnp.float32) + bc_ref[...]  # [TB, Kp]
        out_ref[...] = logits.astype(out_ref.dtype)


def _fused_proto_kernel(x_ref, wb_ref, bb_ref, pt_ref, out_ref,
                        pooled_acc, *, inv_s, eps):
    s_idx = pl.program_id(1)

    @pl.when(s_idx == 0)
    def _init():
        pooled_acc[...] = jnp.zeros_like(pooled_acc)

    pooled_acc[...] += jnp.sum(x_ref[...].astype(jnp.float32), axis=-1)

    @pl.when(s_idx == pl.num_programs(1) - 1)
    def _finalize():
        pooled = (pooled_acc[...] * inv_s).astype(jnp.bfloat16)             # [TB, C]
        feat = jnp.dot(pooled, wb_ref[...],
                       preferred_element_type=jnp.float32) + bb_ref[...]     # [TB, Dp]
        # F.normalize(p=2, dim=1): x / max(||x||, eps)  ==  x * rsqrt(max(||x||^2, eps^2))
        ss = jnp.sum(feat * feat, axis=-1, keepdims=True)                    # [TB, 1]
        inv_norm = jax.lax.rsqrt(jnp.maximum(ss, eps * eps))
        xn = (feat * inv_norm).astype(jnp.bfloat16)
        # Prototypes are pre-L2-normalized, pre-transposed to [Dp, Kp], and already
        # carry the 1/temperature scale.
        logits = jnp.dot(xn, pt_ref[...], preferred_element_type=jnp.float32)
        out_ref[...] = logits.astype(out_ref.dtype)


# ----------------------------------------------------------------------------
# One-time parameter preparation (pad to (8,128)-friendly shapes, fold 1/T,
# pre-normalize & transpose prototypes, cast MXU operands to bf16).
# ----------------------------------------------------------------------------
def prepare_params(raw, num_classes, classifier_type="linear", temperature=1.0):
    C, D = raw["wb"].shape
    Dp = _round_up(D, _LANE)
    Kp = _round_up(num_classes, _LANE)
    inv_t = 1.0 / float(temperature)

    wb = jnp.zeros((C, Dp), jnp.bfloat16).at[:, :D].set(
        raw["wb"].astype(jnp.bfloat16))
    bb = jnp.zeros((1, Dp), jnp.float32).at[0, :D].set(
        raw["bb"].astype(jnp.float32))

    prepared = {"wb": wb, "bb": bb, "C": C, "D": D, "Dp": Dp,
                "K": num_classes, "Kp": Kp}

    if classifier_type == "linear":
        wc = jnp.zeros((Dp, Kp), jnp.float32).at[:D, :num_classes].set(
            raw["w_cls"].astype(jnp.float32) * inv_t)
        bc = jnp.zeros((1, Kp), jnp.float32).at[0, :num_classes].set(
            raw["b_cls"].astype(jnp.float32) * inv_t)
        prepared["w_cls"] = wc.astype(jnp.bfloat16)
        prepared["b_cls"] = bc
    elif classifier_type == "prototypical":
        p = raw["prototypes"].astype(jnp.float32)                            # [K, D]
        norm = jnp.maximum(jnp.linalg.norm(p, axis=1, keepdims=True), 1e-12)
        pn = (p / norm) * inv_t
        pt = jnp.zeros((Dp, Kp), jnp.float32).at[:D, :num_classes].set(pn.T)
        prepared["proto_t"] = pt.astype(jnp.bfloat16)
    else:
        raise ValueError(f"Unsupported classifier type: {classifier_type}")
    return prepared


# ----------------------------------------------------------------------------
# PretrainedModel.forward: one fused pallas_call (features never leave VMEM).
# ----------------------------------------------------------------------------
def pretrained_model_forward(x_nchw, prepared, classifier_type="linear",
                             tb=None, ts=None):
    B, C, H, W = x_nchw.shape
    S = H * W
    D, Dp, K, Kp = prepared["D"], prepared["Dp"], prepared["K"], prepared["Kp"]

    # Tile sizing: sublane-aligned batch tile; spatial tile a multiple of 128 sized so
    # the double-buffered bf16 x-tile stays well inside v7x's 32 MiB scoped VMEM.
    if tb is None:
        tb = min(_round_up(B, _SUBLANE), 64)
    if ts is None:
        budget = 8 * 1024 * 1024                     # bytes per x tile (x2 buffers)
        ts_cap = max(_LANE, (budget // max(tb * C * 2, 1)) // _LANE * _LANE)
        ts = min(_round_up(S, _LANE), ts_cap)

    Bp = _round_up(B, tb)
    Sp = _round_up(S, ts)

    x = x_nchw.reshape(B, C, S).astype(jnp.bfloat16)
    x = jnp.pad(x, ((0, Bp - B), (0, 0), (0, Sp - S)))   # zero-pad: sum unaffected

    nb, ns = Bp // tb, Sp // ts
    inv_s = 1.0 / float(S)                               # mean uses the TRUE S

    in_specs = [
        pl.BlockSpec((tb, C, ts), lambda bi, si: (bi, 0, si)),
        pl.BlockSpec((C, Dp), lambda bi, si: (0, 0)),
        pl.BlockSpec((1, Dp), lambda bi, si: (0, 0)),
    ]
    out_spec = pl.BlockSpec((tb, Kp), lambda bi, si: (bi, 0))
    scratch = [pltpu.VMEM((tb, C), jnp.float32)]

    flops = 2 * Bp * C * Sp + 2 * Bp * C * Dp + 2 * Bp * Dp * Kp
    bytes_accessed = (x.size * 2 + prepared["wb"].size * 2
                      + prepared["bb"].size * 4 + Bp * Kp * 4)
    transcendentals = 0

    if classifier_type == "linear":
        kernel = functools.partial(_fused_linear_kernel, inv_s=inv_s)
        extra = (prepared["w_cls"], prepared["b_cls"])
        in_specs += [pl.BlockSpec((Dp, Kp), lambda bi, si: (0, 0)),
                     pl.BlockSpec((1, Kp), lambda bi, si: (0, 0))]
        bytes_accessed += prepared["w_cls"].size * 2 + prepared["b_cls"].size * 4
    elif classifier_type == "prototypical":
        kernel = functools.partial(_fused_proto_kernel, inv_s=inv_s, eps=1e-12)
        extra = (prepared["proto_t"],)
        in_specs += [pl.BlockSpec((Dp, Kp), lambda bi, si: (0, 0))]
        bytes_accessed += prepared["proto_t"].size * 2
        transcendentals = Bp                                  # one rsqrt per row
    else:
        raise ValueError(f"Unsupported classifier type: {classifier_type}")

    out = pl.pallas_call(
        kernel,
        out_shape=jax.ShapeDtypeStruct((Bp, Kp), jnp.float32),
        grid_spec=pltpu.PrefetchScalarGridSpec(
            num_scalar_prefetch=0,
            grid=(nb, ns),
            in_specs=in_specs,
            out_specs=out_spec,
            scratch_shapes=scratch),
        compiler_params=pltpu.CompilerParams(
            dimension_semantics=("parallel", "arbitrary"),
            vmem_limit_bytes=32 * 1024 * 1024),
        cost_estimate=pl.CostEstimate(
            flops=int(flops),
            transcendentals=int(transcendentals),
            bytes_accessed=int(bytes_accessed)),
    )(x, prepared["wb"], prepared["bb"], *extra)

    return out[:B, :K]


if __name__ == "__main__":
    # Small, module-consistent shapes.
    B, C, H, W = 2, 4, 16, 16        # image input (NCHW)
    feature_dim = 32                 # backbone feature dim
    num_classes = 8
    temperature = 1.0                # ClassifierHead default

    key = jax.random.PRNGKey(0)
    k_x, k_wb, k_bb, k_w, k_b, k_p = jax.random.split(key, 6)

    x = jax.random.normal(k_x, (B, C, H, W), dtype=jnp.float32)

    raw_params = {
        # synthetic backbone params (stand-in for the pretrained backbone)
        "wb": jax.random.normal(k_wb, (C, feature_dim), dtype=jnp.float32) * 0.1,
        "bb": jax.random.normal(k_bb, (feature_dim,), dtype=jnp.float32) * 0.01,
        # linear classifier head (nn.Linear(in_features, num_classes)), stored as [D, K]
        "w_cls": jax.random.normal(k_w, (feature_dim, num_classes), dtype=jnp.float32) * 0.1,
        "b_cls": jax.random.normal(k_b, (num_classes,), dtype=jnp.float32) * 0.01,
        # prototypical classifier: prototypes as if compute_prototypes() had been run.
        "prototypes": jax.random.normal(k_p, (num_classes, feature_dim), dtype=jnp.float32),
    }

    # Pure-JAX f32 reference (matches the PyTorch forward semantics).
    pooled_ref = jnp.mean(x.reshape(B, C, H * W), axis=-1)
    feat_ref = pooled_ref @ raw_params["wb"] + raw_params["bb"]
    ref_linear = (feat_ref @ raw_params["w_cls"] + raw_params["b_cls"]) / temperature
    fn = feat_ref / jnp.maximum(
        jnp.linalg.norm(feat_ref, axis=1, keepdims=True), 1e-12)
    pn = raw_params["prototypes"] / jnp.maximum(
        jnp.linalg.norm(raw_params["prototypes"], axis=1, keepdims=True), 1e-12)
    ref_proto = (fn @ pn.T) / temperature

    # Fused Pallas path.  ts=128 forces a 2-step spatial reduction so the VMEM
    # accumulator / pl.when init-finalize path is exercised.
    prep_lin = prepare_params(raw_params, num_classes, "linear", temperature)
    prep_pro = prepare_params(raw_params, num_classes, "prototypical", temperature)

    logits_linear = pretrained_model_forward(x, prep_lin, "linear", ts=128)
    jax.block_until_ready(logits_linear)
    logits_proto = pretrained_model_forward(x, prep_pro, "prototypical", ts=128)
    jax.block_until_ready(logits_proto)

    assert logits_linear.shape == (B, num_classes)
    assert logits_proto.shape == (B, num_classes)
    np.testing.assert_allclose(np.asarray(logits_linear), np.asarray(ref_linear),
                               atol=2e-2, rtol=2e-2)
    np.testing.assert_allclose(np.asarray(logits_proto), np.asarray(ref_proto),
                               atol=5e-2, rtol=5e-2)
    # cosine similarities must be (approximately, given bf16 operands) in [-1, 1]
    assert bool(jnp.all(jnp.abs(logits_proto) <= 1.0 + 5e-2))

    print("KERNEL_OK")
</pallas_src>

<mosaic_0001>
module attributes {stable_mosaic.version = 11 : i64} {
  func.func @_fused_linear_kernel(%arg0: i32, %arg1: i32, %arg2: memref<8x4x128xbf16, #tpu.memory_space<vmem>>, %arg3: memref<4x128xbf16, #tpu.memory_space<vmem>>, %arg4: memref<1x128xf32, #tpu.memory_space<vmem>>, %arg5: memref<128x128xbf16, #tpu.memory_space<vmem>>, %arg6: memref<1x128xf32, #tpu.memory_space<vmem>>, %arg7: memref<8x128xf32, #tpu.memory_space<vmem>>, %arg8: memref<8x4xf32, #tpu.memory_space<vmem>>) attributes {dimension_semantics = [#tpu.dimension_semantics<parallel>, #tpu.dimension_semantics<arbitrary>], iteration_bounds = array<i64: 1, 2>, scalar_prefetch = 0 : i64, scratch_operands = 1 : i64, tpu.core_type = #tpu.core_type<tc>, window_params = [{transform_indices = @transform_0, window_bounds = array<i64: 8, 4, 128>}, {pipeline_mode = #tpu.pipeline_mode<synchronous>, transform_indices = @transform_1, window_bounds = array<i64: 4, 128>}, {pipeline_mode = #tpu.pipeline_mode<synchronous>, transform_indices = @transform_2, window_bounds = array<i64: 1, 128>}, {pipeline_mode = #tpu.pipeline_mode<synchronous>, transform_indices = @transform_3, window_bounds = array<i64: 128, 128>}, {pipeline_mode = #tpu.pipeline_mode<synchronous>, transform_indices = @transform_4, window_bounds = array<i64: 1, 128>}, {transform_indices = @transform_5, window_bounds = array<i64: 8, 128>}]} {
    %c0_i32 = arith.constant 0 : i32
    %0 = arith.cmpi eq, %arg1, %c0_i32 : i32
    %1 = arith.extui %0 : i1 to i32
    %c0_i32_0 = arith.constant 0 : i32
    %2 = arith.cmpi ne, %1, %c0_i32_0 : i32
    scf.if %2 {
      %cst_8 = arith.constant 0.000000e+00 : f32
      %12 = vector.broadcast %cst_8 : f32 to vector<8x4xf32>
      %c0_9 = arith.constant 0 : index
      %c0_10 = arith.constant 0 : index
      %13 = vector.load %arg8[%c0_9, %c0_10] : memref<8x4xf32, #tpu.memory_space<vmem>>, vector<8x4xf32>
      tpu.vector_store %arg8[%c0_9, %c0_10], %12 {strides = array<i32>} : memref<8x4xf32, #tpu.memory_space<vmem>>, vector<8x4xf32>,
    } else {
    }
    %c0 = arith.constant 0 : index
    %c0_1 = arith.constant 0 : index
    %3 = vector.load %arg8[%c0, %c0_1] : memref<8x4xf32, #tpu.memory_space<vmem>>, vector<8x4xf32>
    %c0_2 = arith.constant 0 : index
    %c0_3 = arith.constant 0 : index
    %c0_4 = arith.constant 0 : index
    %4 = vector.load %arg2[%c0_2, %c0_3, %c0_4] : memref<8x4x128xbf16, #tpu.memory_space<vmem>>, vector<8x4x128xbf16>
    %5 = arith.extf %4 : vector<8x4x128xbf16> to vector<8x4x128xf32>
    %cst = arith.constant dense<0.000000e+00> : vector<8x4xf32>
    %6 = vector.multi_reduction <add>, %5, %cst [2] : vector<8x4x128xf32> to vector<8x4xf32>
    %7 = arith.addf %3, %6 : vector<8x4xf32>
    %c0_5 = arith.constant 0 : index
    %c0_6 = arith.constant 0 : index
    %8 = vector.load %arg8[%c0_5, %c0_6] : memref<8x4xf32, #tpu.memory_space<vmem>>, vector<8x4xf32>
    tpu.vector_store %arg8[%c0_5, %c0_6], %7 {strides = array<i32>} : memref<8x4xf32, #tpu.memory_space<vmem>>, vector<8x4xf32>,
    %c1_i32 = arith.constant 1 : i32
    %9 = arith.cmpi eq, %arg1, %c1_i32 : i32
    %10 = arith.extui %9 : i1 to i32
    %c0_i32_7 = arith.constant 0 : i32
    %11 = arith.cmpi ne, %10, %c0_i32_7 : i32
    scf.if %11 {
      %c0_8 = arith.constant 0 : index
      %c0_9 = arith.constant 0 : index
      %12 = vector.load %arg8[%c0_8, %c0_9] : memref<8x4xf32, #tpu.memory_space<vmem>>, vector<8x4xf32>
      %cst_10 = arith.constant 3.906250e-03 : f32
      %13 = vector.broadcast %cst_10 : f32 to vector<8x4xf32>
      %14 = arith.mulf %12, %13 : vector<8x4xf32>
      %15 = arith.truncf %14 : vector<8x4xf32> to vector<8x4xbf16>
      %c0_11 = arith.constant 0 : index
      %c0_12 = arith.constant 0 : index
      %16 = vector.load %arg3[%c0_11, %c0_12] : memref<4x128xbf16, #tpu.memory_space<vmem>>, vector<4x128xbf16>
      %cst_13 = arith.constant dense<0.000000e+00> : vector<8x128xf32>
      %17 = tpu.matmul %15, %16, %cst_13 {dimension_numbers = #tpu.dot_dimension_numbers<[1], [0], [0], [1], [0, 0, 1, 1], [], []>} : vector<8x4xbf16>, vector<4x128xbf16>, vector<8x128xf32> -> vector<8x128xf32>
      %c0_14 = arith.constant 0 : index
      %c0_15 = arith.constant 0 : index
      %18 = vector.load %arg4[%c0_14, %c0_15] : memref<1x128xf32, #tpu.memory_space<vmem>>, vector<1x128xf32>
      %19 = vector.broadcast %18 : vector<1x128xf32> to vector<8x128xf32>
      %20 = arith.addf %17, %19 : vector<8x128xf32>
      %21 = arith.truncf %20 : vector<8x128xf32> to vector<8x128xbf16>
      %c0_16 = arith.constant 0 : index
      %c0_17 = arith.constant 0 : index
      %22 = vector.load %arg5[%c0_16, %c0_17] : memref<128x128xbf16, #tpu.memory_space<vmem>>, vector<128x128xbf16>
      %cst_18 = arith.constant dense<0.000000e+00> : vector<8x128xf32>
      %23 = tpu.matmul %21, %22, %cst_18 {dimension_numbers = #tpu.dot_dimension_numbers<[1], [0], [0], [1], [0, 0, 1, 1], [], []>} : vector<8x128xbf16>, vector<128x128xbf16>, vector<8x128xf32> -> vector<8x128xf32>
      %c0_19 = arith.constant 0 : index
      %c0_20 = arith.constant 0 : index
      %24 = vector.load %arg6[%c0_19, %c0_20] : memref<1x128xf32, #tpu.memory_space<vmem>>, vector<1x128xf32>
      %25 = vector.broadcast %24 : vector<1x128xf32> to vector<8x128xf32>
      %26 = arith.addf %23, %25 : vector<8x128xf32>
      %c0_21 = arith.constant 0 : index
      %c0_22 = arith.constant 0 : index
      %27 = vector.load %arg7[%c0_21, %c0_22] : memref<8x128xf32, #tpu.memory_space<vmem>>, vector<8x128xf32>
      tpu.vector_store %arg7[%c0_21, %c0_22], %26 {strides = array<i32>} : memref<8x128xf32, #tpu.memory_space<vmem>>, vector<8x128xf32>,
    } else {
    }
    return
  }
  func.func @transform_0(%arg0: i32, %arg1: i32) -> (i32, i32, i32) {
    %c0_i32 = arith.constant 0 : i32
    %c0_i32_0 = arith.constant 0 : i32
    return %arg0, %c0_i32, %arg1 : i32, i32, i32
  }
  func.func @transform_1(%arg0: i32, %arg1: i32) -> (i32, i32) {
    %c0_i32 = arith.constant 0 : i32
    %c0_i32_0 = arith.constant 0 : i32
    %c0_i32_1 = arith.constant 0 : i32
    return %c0_i32, %c0_i32_0 : i32, i32
  }
  func.func @transform_2(%arg0: i32, %arg1: i32) -> (i32, i32) {
    %c0_i32 = arith.constant 0 : i32
    %c0_i32_0 = arith.constant 0 : i32
    %c0_i32_1 = arith.constant 0 : i32
    return %c0_i32, %c0_i32_0 : i32, i32
  }
  func.func @transform_3(%arg0: i32, %arg1: i32) -> (i32, i32) {
    %c0_i32 = arith.constant 0 : i32
    %c0_i32_0 = arith.constant 0 : i32
    %c0_i32_1 = arith.constant 0 : i32
    return %c0_i32, %c0_i32_0 : i32, i32
  }
  func.func @transform_4(%arg0: i32, %arg1: i32) -> (i32, i32) {
    %c0_i32 = arith.constant 0 : i32
    %c0_i32_0 = arith.constant 0 : i32
    %c0_i32_1 = arith.constant 0 : i32
    return %c0_i32, %c0_i32_0 : i32, i32
  }
  func.func @transform_5(%arg0: i32, %arg1: i32) -> (i32, i32) {
    %c0_i32 = arith.constant 0 : i32
    %c0_i32_0 = arith.constant 0 : i32
    return %arg0, %c0_i32 : i32, i32
  }
}

</mosaic_0001>

<bundles_post_ra>
// kernel: tpu_custom_call.1
= control target key start
LH: loop header
LB: loop body
LE: loop exit
PB: predicated region body
PF: predicated region fallthrough
CT: control target
= control target key end

     0   :  { %s1095_s0 = inlined_call_operand.hbm [shape: bf16[8,4,256], index: 0, kind: input, shape index: {}]   ;;  %s1096_s1 = inlined_call_operand.hbm [shape: bf16[4,128], index: 1, kind: input, shape index: {}]   ;;  %s1097_s2 = inlined_call_operand.vmem [shape: f32[1,128], index: 2, kind: input, shape index: {}]   ;;  %s1098_s3 = inlined_call_operand.hbm [shape: bf16[128,128], index: 3, kind: input, shape index: {}]   ;;  %s1099_s4 = inlined_call_operand.vmem [shape: f32[1,128], index: 4, kind: input, shape index: {}]   ;;  %s1100_s5 = inlined_call_operand.hbm [shape: f32[8,128], index: 5, kind: output, shape index: {}]  }
   0x1   :  { %1102 = sst [smem:[#allocation13_spill]] %s1096_s1 }
   0x2   :  { %10 = vsyncpa [#allocation4], 0 }
   0x3   :  { %12 = vsyncpa [#allocation4 + $0x1], 0 }
   0x4   :  { %13 = vsyncpa [#allocation7], 0 }
   0x5   :  { %14 = vsyncpa [#allocation5], 0  ;;  %s943_s18 = smov 0   ;;  %s945_s19 = smov 0  }
   0x6   :  { %s947_s20 = smov 0   ;;  %s949_s21 = smov 0  }
   0x7   :  { %s951_s22 = smov 0   ;;  %s953_s23 = smov 0  }
   0x8 LB: > { %s1101_s24 = sadd.s32 4294967295, %s903_s23   ;;  %s41_s25 = sadd.s32 1, %s891_s20  ;;  %s903_s23 = sphi %s953_s23, %s20_s23   ;;  %s899_s22 = sphi %s951_s22, %s1114_s22   ;;  %s895_s21 = sphi %s949_s21, %s1113_s21   ;;  %s891_s20 = sphi %s947_s20, %s1112_s20   ;;  %s887_s19 = sphi %s945_s19, %s1111_s19   ;;  %s883_s18 = sphi %s943_s18, %s1110_s18  }
   0x9   : > { %p48_p0 = scmp.ne.s32.totalorder %s891_s20, %s887_s19  ;;  %p49_p1 = scmp.eq.s32.totalorder %s903_s23, 0 }
   0xa   : > { %p54_p2 = scmp.ne.s32.totalorder %s887_s19, %s883_s18  ;;  %p979_p3 = scmp.eq.s32.totalorder %s1101_s24, 0 }
   0xb   : > { %p983_p4 = por %p49_p1, %p48_p0  ;;  %p580_p5 = scmp.ge.s32.totalorder %s903_s23, 1 }
   0xc   : > { %p990_p6 = por %p979_p3, %p54_p2  ;;  %p175_p7 = scmp.lt.s32.totalorder %s903_s23, 3 }
   0xd   : > { %s1106_s1 = sld [smem:[#allocation13_spill]]  ;;  %s905_s8 = smov [#allocation6]  }
   0xe   : > { %p998_p8 = pnand %p580_p5, %p175_p7  ;;  %s189_s9 = sshll.u32 %s905_s8, 4  ;;  %s190_s9 = int_to_ptr.vmem [resolvable:$true] %s189_s9 }
   0xf   : > { %p664_p10 = scmp.lt.s32.totalorder %s903_s23, 2  ;;  %s201_s12 = sshll.u32 %s1098_s3, 4  ;;  %s202_s12 = int_to_ptr.hbm [resolvable:$true] %s201_s12 }
  0x10   : > { %p651_p9 = pneg %p998_p8  ;;  %s906_s14 = smov [#allocation8]  }
  0x11   : > { %p1012_p12 = pnand %p664_p10, %p983_p4  ;;  %s203_s15 = sshll.u32 %s906_s14, 4  ;;  %s204_s15 = int_to_ptr.vmem [resolvable:$true] %s203_s15 }
  0x12   : > { %p652_p11 = pnand %p651_p9, %p979_p3  ;;  %s907_s16 = smov 64  }
  0x13   : > { %s187_s6 = sshll.u32 %s1106_s1, 4  ;;  %s908_s17 = smov 4   ;;  %s188_s6 = int_to_ptr.hbm [resolvable:$true] %s187_s6 }
  0x14   : > { %654 = dma.hbm_to_vmem [thread:$0]  (!%p652_p11), %s188_s6, 32, %s190_s9, [#allocation7]  }
  0x15   : > { %657 = dma.hbm_to_vmem [thread:$0]  (!%p652_p11), %s202_s12, 1024, %s204_s15, [#allocation7], %s907_s16, %s907_s16, %s908_s17  }
  0x16   : > { %s220_s18 = sand.u32 1, %s891_s20   ;;  %s29_s29 = sadd.s32 1, %s899_s22 }
  0x17   : > { %p30_p13 = scmp.ge.s32.totalorder %s29_s29, 2  ;;  %s584_s27 = sshll.u32 %s220_s18, 4 }
  0x18   : > { %s585_s30 = sshll.u32 %s899_s22, 1  ;;  %s224_s9 = scalar_lea.vmem [#allocation3], %s584_s27 }
  0x19   : > { %s1116_s29 = smov (%p30_p13, %s29_s29), 0  ;;  %s231_s6 = scalar_lea.hbm %s1095_s0, %s585_s30 }
  0x1a   : > { %s234_s11 = sshll.u32 %s224_s9, 4  ;;  %s37_s14 = ssub.s32 %s899_s22, %s1116_s29  ;;  %s235_s11 = int_to_ptr.vmem [resolvable:$true] %s234_s11 }
  0x1b   : > { %s232_s24 = sshll.u32 %s231_s6, 4  ;;  %p39_p0 = scmp.eq.s32.totalorder %s37_s14, 0  ;;  %s233_s24 = int_to_ptr.hbm [resolvable:$true] %s232_s24 }
  0x1c   : > { %s221_s15 = scalar_lea.sflag [#allocation4], %s220_s18  ;;  %s909_s17 = smov 32  }
  0x1d   : > { %s1029_s12 = scalar_select %p39_p0, %s891_s20, %s41_s25  }
  0x1e   : > { %s910_s1 = smov 2   ;;  %246 = sbr.rel (%p998_p8) target bundleno = 471 (0x1d7), region = 40 }
  0x1f   : > { %661 = dma.hbm_to_vmem [thread:$0]  (!%p1012_p12), %s233_s24, 256, %s235_s11, %s221_s15, %s907_s16, %s909_s17, %s910_s1  }
  0x20   : > { %s248_s27 = sand.u32 (!%p998_p8), 1, %s887_s19  }
  0x21   : > { %s587_s30 = sshll.u32 (!%p998_p8), %s248_s27, 4  ;;  %s249_s8 = scalar_lea.sflag (!%p998_p8), [#allocation4], %s248_s27 }
  0x22   : > { %s1036_s10 = scalar_lea.vmem (!%p998_p8), [#allocation3], %s587_s30 }
  0x23   : > { %870 = dma.done.wait (%p990_p6), %s249_s8, 256  }
  0x24   : > { %872 = vsyncadd (%p990_p6), %s249_s8, 4294967040 }
  0x25   : > { %874 = dma.done.wait (%p979_p3), [#allocation7], 1056  }
  0x26   : > { %876 = vsyncadd (%p979_p3), [#allocation7], 4294966240  ;;  %p590_p1 = scmp.ne.s32.totalorder %s895_s21, 0 }
  0x28   : > { %290 = sbr.rel (%p590_p1) target bundleno = 47 (0x2f), region = 56 }
  0x2d   : > { %vm291_vm0 = vcmask 31744   ;;  %v911_v0 = vmov 0.0  }
  0x2e   : > { %292 = vst.msk [vmem:[#allocation2] sm:$0xff] %vm291_vm0, %v911_v0 }
  0x2f PF: > { %v294_v1 = vld [vmem:[%s1036_s10] sm:$0x3]  ;;  %vm310_vm1 = vcmask 1043456   ;;  %v296_v2 = vld [vmem:[%s1036_s10 + $0x4] sm:$0x3]  ;;  %v343_v27 = vlaneseq  ;;  %vm353_vm2 = vcmask 1041409  }
  0x30   : > { %v302_v3 = vunpack.c.l.bf16 %v294_v1  ;;  %v304_v4 = vunpack.c.l.bf16 %v296_v2  ;;  %v298_v5 = vld [vmem:[%s1036_s10 + $0x8] sm:$0x3]  ;;  %v295_v7 = vld [vmem:[%s1036_s10 + $0x2] sm:$0x3]  ;;  %v297_v8 = vld [vmem:[%s1036_s10 + $0x6] sm:$0x3] }
  0x31   : > { %v306_v6 = vunpack.c.l.bf16 %v298_v5  ;;  %v299_v11 = vld [vmem:[%s1036_s10 + $0xa] sm:$0x3]  ;;  %v303_v13 = vunpack.c.l.bf16 %v295_v7  ;;  %v305_v14 = vunpack.c.l.bf16 %v297_v8  ;;  %v300_v19 = vld [vmem:[%s1036_s10 + $0xc] sm:$0x3]  ;;  %v301_v20 = vld [vmem:[%s1036_s10 + $0xe] sm:$0x3] }
  0x32   : > { %v311_v9 = vsel %vm310_vm1, %v302_v3, 0.0  ;;  %v317_v10 = vsel %vm310_vm1, %v304_v4, 0.0  ;;  %v307_v15 = vunpack.c.l.bf16 %v299_v11  ;;  %v308_v21 = vunpack.c.l.bf16 %v300_v19  ;;  %p591_p2 = scmp.ne.s32.totalorder %s895_s21, 1 }
  0x33   : > { %312 = vadd.xlane.f32.xlu0 %v311_v9  ;;  %318 = vadd.xlane.f32.xlu1 %v317_v10  ;;  %v323_v12 = vsel %vm310_vm1, %v306_v6, 0.0  ;;  %v314_v16 = vsel %vm310_vm1, %v303_v13, 0.0  ;;  %v320_v17 = vsel %vm310_vm1, %v305_v14, 0.0  ;;  %v309_v22 = vunpack.c.l.bf16 %v301_v20 }
  0x34   : > { %324 = vadd.xlane.f32.xlu2 %v323_v12  ;;  %v326_v18 = vsel %vm310_vm1, %v307_v15, 0.0  ;;  %v329_v23 = vsel %vm310_vm1, %v308_v21, 0.0  ;;  %v344_v29 = vand.u32 127, %v343_v27  ;;  %vm355_vm3 = vcmask 1042434  }
  0x35   : > { %v332_v24 = vsel %vm310_vm1, %v309_v22, 0.0  ;;  %vm357_vm4 = vcmask 1043459   ;;  %vm359_vm5 = vcmask 1044484   ;;  %vm361_vm6 = vcmask 1045509   ;;  %v293_v48 = vld [vmem:[#allocation2] sm:$0xff] }
  0x36   : > { %vm363_vm7 = vcmask 1046534   ;;  %vm365_vm8 = vcmask 1047559   ;;  %vm369_vm9 = vcmask 31744  }
  0x3b   : > { %315 = vadd.xlane.f32.xlu0 %v314_v16  ;;  %321 = vadd.xlane.f32.xlu1 %v320_v17 }
  0x3c   : > { %327 = vadd.xlane.f32.xlu2 %v326_v18 }
  0x43   : > { %330 = vadd.xlane.f32.xlu0 %v329_v23  ;;  %333 = vadd.xlane.f32.xlu1 %v332_v24 }
  0xa6   : > { %v313_v25 = vpop.xlane.xlu0 %312  ;;  %v319_v26 = vpop.xlane.xlu1 %318 }
  0xa7   : > { %v325_v28 = vpop.xlane.xlu2 %324  ;;  %v345_v32 = vperm.slane %v313_v25, %v344_v29  ;;  %v347_v35 = vperm.slane %v319_v26, %v344_v29 }
  0xa8   : > { %v349_v39 = vperm.slane %v325_v28, %v344_v29 }
  0xae   : > { %v316_v30 = vpop.xlane.xlu0 %315  ;;  %v322_v31 = vpop.xlane.xlu1 %321 }
  0xaf   : > { %v346_v33 = vperm.slane %v316_v30, %v344_v29  ;;  %v348_v34 = vperm.slane %v322_v31, %v344_v29  ;;  %v328_v37 = vpop.xlane.xlu2 %327 }
  0xb0   : > { %v350_v41 = vperm.slane %v328_v37, %v344_v29 }
  0xb1   : > { %v354_v36 = vsel %vm353_vm2, %v346_v33, %v345_v32 }
  0xb2   : > { %v356_v38 = vsel %vm355_vm3, %v347_v35, %v354_v36 }
  0xb3   : > { %v358_v40 = vsel %vm357_vm4, %v348_v34, %v356_v38 }
  0xb4   : > { %v360_v42 = vsel %vm359_vm5, %v349_v39, %v358_v40 }
  0xb5   : > { %v362_v47 = vsel %vm361_vm6, %v350_v41, %v360_v42 }
  0xb6   : > { %v331_v43 = vpop.xlane.xlu0 %330  ;;  %v334_v44 = vpop.xlane.xlu1 %333 }
  0xb7   : > { %v351_v45 = vperm.slane %v331_v43, %v344_v29  ;;  %v352_v46 = vperm.slane %v334_v44, %v344_v29 }
  0xb9   : > { %v364_v49 = vsel %vm363_vm7, %v351_v45, %v362_v47  ;;  %374 = sbr.rel (%p591_p2) target bundleno = 465 (0x1d1), region = 60 }
  0xba   : > { %v366_v50 = vsel %vm365_vm8, %v352_v46, %v364_v49 }
  0xbb   : > { %v368_v51 = vadd.f32 %v366_v50, %v293_v48 }
  0xbd   : > { %370 = vst.msk [vmem:[#allocation2] sm:$0xff] %vm369_vm9, %v368_v51 }
  0xbe   : > { %v378_v52 = vld [vmem:[#allocation6] sm:$0x3]  ;;  %vm386_vm10 = vcmask 1041408   ;;  %v635_v57 = vld [vmem:[#allocation8 + $0x30] sm:$0xff]  ;;  %v634_v59 = vld [vmem:[#allocation8 + $0x28] sm:$0xff] }
  0xbf   : > { %v636_v54 = vld [vmem:[#allocation8 + $0x38] sm:$0xff]  ;;  %v388_v55 = vsel %vm386_vm10, %v378_v52, 0  ;;  %v633_v60 = vld [vmem:[#allocation8 + $0x20] sm:$0xff]  ;;  %v631_v62 = vld [vmem:[#allocation8 + $0x10] sm:$0xff] }
  0xc0   : > { %397 = vmatpush.bf16.msra.mxu0 %v388_v55  ;;  %472 = vmatpush.bf16.msra.mxu1 %v636_v54  ;;  %v632_v61 = vld [vmem:[#allocation8 + $0x18] sm:$0xff]  ;;  %v630_v63 = vld [vmem:[#allocation8 + $0x8] sm:$0xff]  ;;  %v629_v0 = vld [vmem:[#allocation8] sm:$0xff] }
  0xc1   : > { %v725_v1 = vld [vmem:[%s1097_s2] ss:$0 sm:$0xff] }
  0xc2   : > { %v726_v6 = vld [vmem:[%s1099_s4] ss:$0 sm:$0xff] }
  0xc4   : > { %v375_v53 = vld [vmem:[#allocation2] sm:$0xff]  ;;  %473 = vmatpush.bf16.msra.mxu1 %v635_v57 }
  0xc5   : > { %v376_v56 = vmul.f32 0.00390625, %v375_v53 }
  0xc7   : > { %v377_v58 = vpack.c.bf16 %v376_v56, %v376_v56 }
  0xc8   : > { %474 = vmatpush.bf16.msra.mxu1 %v634_v59 }
  0xc9   : > { %592 = vmatmul.msk.bf16.vlgmr.msra.gmra.mxu0 %vm369_vm9, %v377_v58 }
  0xcc   : > { %475 = vmatpush.bf16.msra.mxu1 %v633_v60 }
  0xd0   : > { %476 = vmatpush.bf16.msra.mxu1 %v632_v61 }
  0xd4   : > { %477 = vmatpush.bf16.msra.mxu1 %v631_v62 }
  0xd8   : > { %478 = vmatpush.bf16.msra.mxu1 %v630_v63 }
  0xdc   : > { %479 = vmatpush.bf16.msra.mxu1 %v629_v0 }
 0x146   : > { %v399_v2 = vpop.f32.mrf.mxu0 }
 0x147   : > { %v400_v3 = vadd.f32 %v725_v1, %v399_v2 }
 0x149   : > { %v403_v4 = vpack.c.bf16 %v400_v3, %v400_v3 }
 0x14b   : > { %480 = vmatmul.bf16.vlgmr.msra.gmra.mxu1 %v403_v4 }
 0x14e   : > { %v401_v5 = vpop.f32.mrf.mxu0 }
 0x1c8   : > { %v481_v7 = vpop.f32.mrf.mxu1 }
 0x1c9   : > { %v482_v8 = vadd.f32 %v726_v6, %v481_v7 }
 0x1cb   : > { %485 = vst [vmem:[#allocation9] sm:$0xff] %v482_v8 }
 0x1d0   : > { %v483_v9 = vpop.f32.mrf.mxu1 }
 0x1d1 PF: > { %s1109_s26 = sadd.s32 4294967295, %s903_s23   ;;  %s496_s13 = sshll.u32 %s1100_s5, 4  ;;  %s497_s13 = int_to_ptr.hbm [resolvable:$true] %s496_s13 }
 0x1d2   : > { %p667_p3 = scmp.eq.s32.totalorder %s1109_s26, 1  ;;  %s912_s16 = smov [#allocation9]  }
 0x1d3   : > { %s494_s18 = sshll.u32 %s912_s16, 4  ;;  %s495_s18 = int_to_ptr.vmem [resolvable:$true] %s494_s18 }
 0x1d4   : > { %648 = dma.vmem_to_hbm [thread:$0]  (%p667_p3), %s495_s18, 128, %s497_s13, [#allocation5]  }
 0x1d5   : > { %878 = dma.done.wait (%p667_p3), [#allocation5], 128  }
 0x1d6   : > { %880 = vsyncadd (%p667_p3), [#allocation5], 4294967168 }
 0x1d7 PF: > { %s20_s23 = sadd.s32 1, %s903_s23   ;;  %s1110_s18 = smov %s887_s19 }
 0x1d8   : > { %p17_p4 = scmp.ge.s32.totalorder %s20_s23, 4   ;;  %s1111_s19 = smov %s891_s20 }
 0x1d9   : > { %s1112_s20 = smov %s1029_s12  ;;  %s1113_s21 = smov %s899_s22 }
 0x1da   : > { %s1114_s22 = smov %s1116_s29  ;;  %19 = sbr.rel (!%p17_p4) target bundleno = 8 (0x8), region = 94 }
 0x1df   :  { %510 = vsyncpa [#allocation4], 1 }
 0x1e0   :  { %512 = vsyncpa [#allocation4 + $0x1], 1 }
 0x1e1   :  { %513 = vsyncpa [#allocation7], 1 }
 0x1e2   :  { %514 = vsyncpa [#allocation5], 1 }
 0x1e3   :  { %516 = vsyncpa [#allocation5 + $0x1], 1 }

</bundles_post_ra>
